<compile_context>
chip_gen: v5e
topology: v5e:2x2
jax: 0.10.0
libtpu: 0.0.40
codegen_flags: <defaults>
</compile_context>

<pallas_src>
import jax
import jax.numpy as jnp
from jax.experimental import pallas as pl
from jax.experimental.pallas import tpu as pltpu

NEG_SLOPE = 0.2          # cfg.negativeslope (standard GAT default)
MASK_VALUE = -9e15       # -9000000000000000.0 from the PyTorch module


def _round_up(x, m):
    return (x + m - 1) // m * m


def gat_proj_kernel(X_ref, Ws_ref, ac_ref, Wh_ref, wh12_ref):
    # Wh = X @ Ws (f32 accumulate), stored bf16 for the later MXU matmul.
    Wh = jnp.dot(X_ref[...], Ws_ref[...], preferred_element_type=jnp.float32)
    Wh_ref[...] = Wh.astype(Wh_ref.dtype)
    # Fused attention-vector projection: wh12 = Wh @ [a1 a2]  -> (TQ, 2)
    wh12_ref[...] = jnp.dot(Wh, ac_ref[...], preferred_element_type=jnp.float32)


def gat_attn_kernel(E_ref, wh1_ref, wh2_ref, Wh_ref, H_ref):
    # Attention logits for this row tile: (TQ,1) + (1,Np) lane-dense broadcast.
    e = wh1_ref[...] + wh2_ref[...]
    # Fused leaky_relu + adjacency mask in a single select chain.
    # (wrapper already applied the reference "E > 0" test, mask is {0,1} int8)
    e = jnp.where(E_ref[...] != 0,
                  jnp.where(e > 0, e, NEG_SLOPE * e),
                  MASK_VALUE)
    # Row softmax; normalization deferred past the matmul (commutes through).
    m = jnp.max(e, axis=1, keepdims=True)
    p = jnp.exp(e - m)
    s = jnp.sum(p, axis=1, keepdims=True)
    acc = jnp.dot(p.astype(jnp.bfloat16), Wh_ref[...],
                  preferred_element_type=jnp.float32)
    H_ref[...] = (acc * pl.reciprocal(s, approx=True)).astype(H_ref.dtype)


def gat_forward(E, X, Ws, a, *, tq=128):
    """E: (N, N) dense adjacency, X: (N, F), Ws: (F, G), a: (2G, 1)."""
    N, F = X.shape
    G = Ws.shape[1]

    # Adjacency -> int8 {0,1} mask (apply the reference "> 0" semantics here
    # so the kernel streams 1 byte per entry instead of 4).
    E_mask = (E > 0).astype(jnp.int8)

    # Fuse a1 / a2 into one (G, 2) projection matrix.
    a_cat = jnp.concatenate([a[:G, :], a[G:, :]], axis=1)

    # Pad N to a multiple of 128 (lane-dense adjacency tiles, int8-friendly
    # row tiles); make sure the row tile divides the padded extent.
    Np = _round_up(N, 128)
    tq = min(_round_up(max(tq, 1), 128), Np)
    if Np % tq:
        tq = 128
    if Np != N:
        X = jnp.pad(X, ((0, Np - N), (0, 0)))
        E_mask = jnp.pad(E_mask, ((0, Np - N), (0, Np - N)))

    grid = (Np // tq,)
    params = pltpu.CompilerParams(
        dimension_semantics=("parallel",),
        vmem_limit_bytes=32 * 1024 * 1024,
    )

    # --- kernel 1: Wh = X @ Ws (bf16), wh12 = Wh @ [a1 a2] (f32), row-tiled ---
    Wh, wh12 = pl.pallas_call(
        gat_proj_kernel,
        out_shape=(jax.ShapeDtypeStruct((Np, G), jnp.bfloat16),
                   jax.ShapeDtypeStruct((Np, 2), jnp.float32)),
        grid=grid,
        in_specs=[pl.BlockSpec((tq, F), lambda i: (i, 0)),
                  pl.BlockSpec((F, G), lambda i: (0, 0)),
                  pl.BlockSpec((G, 2), lambda i: (0, 0))],
        out_specs=(pl.BlockSpec((tq, G), lambda i: (i, 0)),
                   pl.BlockSpec((tq, 2), lambda i: (i, 0))),
        compiler_params=params,
    )(X, Ws, a_cat)

    wh1 = wh12[:, 0:1]                      # (Np, 1) per-row score term
    wh2_row = wh12[:, 1:2].reshape(1, Np)   # (1, Np) per-column term; transpose
                                            # hoisted out of the per-tile loop

    # --- kernel 2: streamed mask + softmax + att @ Wh, row-tiled ---
    H = pl.pallas_call(
        gat_attn_kernel,
        out_shape=jax.ShapeDtypeStruct((Np, G), jnp.float32),
        grid=grid,
        in_specs=[pl.BlockSpec((tq, Np), lambda i: (i, 0)),   # E tile (int8)
                  pl.BlockSpec((tq, 1), lambda i: (i, 0)),    # wh1 tile
                  pl.BlockSpec((1, Np), lambda i: (0, 0)),    # wh2 row (resident)
                  pl.BlockSpec((Np, G), lambda i: (0, 0))],   # Wh (resident, bf16)
        out_specs=pl.BlockSpec((tq, G), lambda i: (i, 0)),
        compiler_params=params,
    )(E_mask, wh1, wh2_row, Wh)

    return H[:N]


def gat_reference(E, X, Ws, a):
    G = Ws.shape[1]
    Wh = X @ Ws
    wh1 = Wh @ a[:G, :]
    wh2 = Wh @ a[G:, :]
    e = wh1 + wh2.T
    e = jnp.where(e > 0, e, NEG_SLOPE * e)
    att = jnp.where(E > 0, e, MASK_VALUE)
    att = jax.nn.softmax(att, axis=1)
    return att @ Wh


def xavier_uniform(key, shape, gain=1.0):
    fan_in, fan_out = shape[0], shape[1]
    bound = gain * jnp.sqrt(6.0 / (fan_in + fan_out))
    return jax.random.uniform(key, shape, jnp.float32, minval=-bound, maxval=bound)


if __name__ == "__main__":
    key = jax.random.PRNGKey(0)
    k_ws, k_a, k_x1, k_e1, k_x2, k_e2 = jax.random.split(key, 6)

    feature_size = 64
    graph_embedding_size = 16

    # Deterministic parameter init matching the module's __init__ shapes.
    Ws = xavier_uniform(k_ws, (feature_size, graph_embedding_size), gain=1.0)
    a = xavier_uniform(k_a, (2 * graph_embedding_size, 1), gain=1.414)

    def run_case(kx, ke, num_nodes, tq):
        X = jax.random.normal(kx, (num_nodes, feature_size), jnp.float32)
        E = (jax.random.uniform(ke, (num_nodes, num_nodes)) > 0.7).astype(jnp.float32)
        E = E + jnp.eye(num_nodes, dtype=jnp.float32)  # every row has a neighbor
        H = gat_forward(E, X, Ws, a, tq=tq)
        jax.block_until_ready(H)
        H_ref = gat_reference(E, X, Ws, a)
        assert H.shape == (num_nodes, graph_embedding_size)
        # tolerance accounts for the intentional bf16 att@Wh matmul
        assert jnp.allclose(H, H_ref, atol=5e-2, rtol=5e-2), (
            f"mismatch vs reference (N={num_nodes})")

    run_case(k_x1, k_e1, 256, 128)   # 2 row tiles, no padding
    run_case(k_x2, k_e2, 200, 128)   # exercises the row/column padding path

    print("KERNEL_OK")
</pallas_src>

<mosaic_0001>
module attributes {stable_mosaic.version = 11 : i64} {
  func.func @gat_proj_kernel(%arg0: i32, %arg1: memref<128x64xf32, #tpu.memory_space<vmem>>, %arg2: memref<64x16xf32, #tpu.memory_space<vmem>>, %arg3: memref<16x2xf32, #tpu.memory_space<vmem>>, %arg4: memref<128x16xbf16, #tpu.memory_space<vmem>>, %arg5: memref<128x2xf32, #tpu.memory_space<vmem>>) attributes {dimension_semantics = [#tpu.dimension_semantics<parallel>], iteration_bounds = array<i64: 2>, scalar_prefetch = 0 : i64, scratch_operands = 0 : i64, tpu.core_type = #tpu.core_type<tc>, window_params = [{transform_indices = @transform_0, window_bounds = array<i64: 128, 64>}, {pipeline_mode = #tpu.pipeline_mode<synchronous>, transform_indices = @transform_1, window_bounds = array<i64: 64, 16>}, {pipeline_mode = #tpu.pipeline_mode<synchronous>, transform_indices = @transform_2, window_bounds = array<i64: 16, 2>}, {transform_indices = @transform_3, window_bounds = array<i64: 128, 16>}, {transform_indices = @transform_4, window_bounds = array<i64: 128, 2>}]} {
    %c0 = arith.constant 0 : index
    %c0_0 = arith.constant 0 : index
    %0 = vector.load %arg1[%c0, %c0_0] : memref<128x64xf32, #tpu.memory_space<vmem>>, vector<128x64xf32>
    %c0_1 = arith.constant 0 : index
    %c0_2 = arith.constant 0 : index
    %1 = vector.load %arg2[%c0_1, %c0_2] : memref<64x16xf32, #tpu.memory_space<vmem>>, vector<64x16xf32>
    %cst = arith.constant dense<0.000000e+00> : vector<128x16xf32>
    %2 = tpu.matmul %0, %1, %cst {dimension_numbers = #tpu.dot_dimension_numbers<[1], [0], [0], [1], [0, 0, 1, 1], [], []>} : vector<128x64xf32>, vector<64x16xf32>, vector<128x16xf32> -> vector<128x16xf32>
    %3 = arith.truncf %2 : vector<128x16xf32> to vector<128x16xbf16>
    %c0_3 = arith.constant 0 : index
    %c0_4 = arith.constant 0 : index
    %4 = vector.load %arg4[%c0_3, %c0_4] : memref<128x16xbf16, #tpu.memory_space<vmem>>, vector<128x16xbf16>
    tpu.vector_store %arg4[%c0_3, %c0_4], %3 {strides = array<i32>} : memref<128x16xbf16, #tpu.memory_space<vmem>>, vector<128x16xbf16>,
    %c0_5 = arith.constant 0 : index
    %c0_6 = arith.constant 0 : index
    %5 = vector.load %arg3[%c0_5, %c0_6] : memref<16x2xf32, #tpu.memory_space<vmem>>, vector<16x2xf32>
    %cst_7 = arith.constant dense<0.000000e+00> : vector<128x2xf32>
    %6 = tpu.matmul %2, %5, %cst_7 {dimension_numbers = #tpu.dot_dimension_numbers<[1], [0], [0], [1], [0, 0, 1, 1], [], []>} : vector<128x16xf32>, vector<16x2xf32>, vector<128x2xf32> -> vector<128x2xf32>
    %c0_8 = arith.constant 0 : index
    %c0_9 = arith.constant 0 : index
    %7 = vector.load %arg5[%c0_8, %c0_9] : memref<128x2xf32, #tpu.memory_space<vmem>>, vector<128x2xf32>
    tpu.vector_store %arg5[%c0_8, %c0_9], %6 {strides = array<i32>} : memref<128x2xf32, #tpu.memory_space<vmem>>, vector<128x2xf32>,
    return
  }
  func.func @transform_0(%arg0: i32) -> (i32, i32) {
    %c0_i32 = arith.constant 0 : i32
    %c0_i32_0 = arith.constant 0 : i32
    return %arg0, %c0_i32 : i32, i32
  }
  func.func @transform_1(%arg0: i32) -> (i32, i32) {
    %c0_i32 = arith.constant 0 : i32
    %c0_i32_0 = arith.constant 0 : i32
    %c0_i32_1 = arith.constant 0 : i32
    return %c0_i32, %c0_i32_0 : i32, i32
  }
  func.func @transform_2(%arg0: i32) -> (i32, i32) {
    %c0_i32 = arith.constant 0 : i32
    %c0_i32_0 = arith.constant 0 : i32
    %c0_i32_1 = arith.constant 0 : i32
    return %c0_i32, %c0_i32_0 : i32, i32
  }
  func.func @transform_3(%arg0: i32) -> (i32, i32) {
    %c0_i32 = arith.constant 0 : i32
    %c0_i32_0 = arith.constant 0 : i32
    return %arg0, %c0_i32 : i32, i32
  }
  func.func @transform_4(%arg0: i32) -> (i32, i32) {
    %c0_i32 = arith.constant 0 : i32
    %c0_i32_0 = arith.constant 0 : i32
    return %arg0, %c0_i32 : i32, i32
  }
}

</mosaic_0001>

<bundles_post_ra>
// kernel: tpu_custom_call.1
= control target key start
LH: loop header
LB: loop body
LE: loop exit
PB: predicated region body
PF: predicated region fallthrough
CT: control target
= control target key end

     0   :  { %s705_s15 = smov 0   ;;  %s881_s0 = inlined_call_operand.vmem [shape: f32[256,64], index: 0, kind: input, shape index: {}]   ;;  %s882_s1 = inlined_call_operand.vmem [shape: f32[64,16], index: 1, kind: input, shape index: {}]   ;;  %s883_s2 = inlined_call_operand.vmem [shape: f32[16,2], index: 2, kind: input, shape index: {}]   ;;  %s884_s3 = inlined_call_operand.vmem [shape: bf16[256,16], index: 3, kind: output, shape index: {0}]   ;;  %s885_s4 = inlined_call_operand.vmem [shape: f32[256,2], index: 4, kind: output, shape index: {1}]  }
   0x1 LB: > { %s609_s16 = sadd.s32 4294967295, %s678_s15   ;;  %p613_p0 = scmp.ge.s32.totalorder %s678_s15, 1  ;;  %s678_s15 = sphi %s705_s15, %s15_s15  }
   0x2   : > { %p166_p1 = scmp.lt.s32.totalorder %s678_s15, 3 }
   0x4   : > { %p167_p2 = pnand %p613_p0, %p166_p1 }
   0x5   : > { %s614_s21 = sshll.u32 (!%p167_p2), %s609_s16, 4 }
   0x6   : > { %170 = sbr.rel (%p167_p2) target bundleno = 348 (0x15c), region = 32  ;;  %p198_p3 = scmp.lt.s32.totalorder (!%p167_p2), %s614_s21, 31 }
   0xb   : > { %v238_v0 = vld [vmem:[%s882_s1 + $0x38] sm:$0xff]  ;;  %v237_v1 = vld [vmem:[%s882_s1 + $0x30] sm:$0xff]  ;;  %v236_v2 = vld [vmem:[%s882_s1 + $0x28] sm:$0xff]  ;;  %s887_s21 = smov (!%p198_p3, %s614_s21), 31  ;;  %vm239_vm0 = vcmask 523264   ;;  %vm388_vm1 = vcmask 130048  }
   0xc   : > { %296 = vmatpush.msra.mxu0 %v238_v0  ;;  %654 = vmatpush.msra.mxu2 %v238_v0  ;;  %v235_v3 = vld [vmem:[%s882_s1 + $0x20] sm:$0xff]  ;;  %v234_v4 = vld [vmem:[%s882_s1 + $0x18] sm:$0xff]  ;;  %s615_s28 = sshll.u32 %s887_s21, 3  ;;  %v233_v5 = vld [vmem:[%s882_s1 + $0x10] sm:$0xff]  ;;  %s617_s17 = sshll.u32 %s887_s21, 2  ;;  %vm369_vm2 = vcmask 125952  }
   0xd   : > { %v232_v6 = vld [vmem:[%s882_s1 + $0x8] sm:$0xff]  ;;  %s742_s9 = scalar_lea.vmem %s881_s0, %s615_s28  ;;  %v231_v7 = vld [vmem:[%s882_s1] sm:$0xff]  ;;  %s789_s20 = scalar_lea.vmem %s884_s3, %s617_s17  ;;  %vm502_vm3 = vcmask 15360  }
   0xe   : > { %297 = vmatpush.msra.mxu0 %v237_v1  ;;  %655 = vmatpush.msra.mxu2 %v237_v1  ;;  %v215_v8 = vld [vmem:[%s742_s9] sm:$0xff]  ;;  %v216_v10 = vld [vmem:[%s742_s9 + $0x8] sm:$0xff]  ;;  %v217_v12 = vld [vmem:[%s742_s9 + $0x10] sm:$0xff]  ;;  %s844_s24 = scalar_lea.vmem %s885_s4, %s615_s28 }
   0xf   : > { %v223_v9 = vld [vmem:[%s742_s9 + $0x40] sm:$0xff]  ;;  %v224_v11 = vld [vmem:[%s742_s9 + $0x48] sm:$0xff]  ;;  %v225_v13 = vld [vmem:[%s742_s9 + $0x50] sm:$0xff] }
  0x10   : > { %298 = vmatpush.msra.mxu0 %v236_v2  ;;  %656 = vmatpush.msra.mxu2 %v236_v2  ;;  %v218_v14 = vld [vmem:[%s742_s9 + $0x18] sm:$0xff]  ;;  %v387_v16 = vld [vmem:[%s883_s2 + $0x8] sm:$0xff]  ;;  %v219_v17 = vld [vmem:[%s742_s9 + $0x20] sm:$0xff] }
  0x11   : > { %v226_v15 = vld [vmem:[%s742_s9 + $0x58] sm:$0xff]  ;;  %451 = vmatpush.msra.mxu1 %v387_v16  ;;  %662 = vmatpush.msra.mxu3 %v387_v16  ;;  %v227_v18 = vld [vmem:[%s742_s9 + $0x60] sm:$0xff]  ;;  %v220_v19 = vld [vmem:[%s742_s9 + $0x28] sm:$0xff] }
  0x12   : > { %299 = vmatpush.msra.mxu0 %v235_v3  ;;  %657 = vmatpush.msra.mxu2 %v235_v3  ;;  %v228_v20 = vld [vmem:[%s742_s9 + $0x68] sm:$0xff]  ;;  %v221_v21 = vld [vmem:[%s742_s9 + $0x30] sm:$0xff]  ;;  %v222_v23 = vld [vmem:[%s742_s9 + $0x38] sm:$0xff] }
  0x13   : > { %v229_v22 = vld [vmem:[%s742_s9 + $0x70] sm:$0xff]  ;;  %v230_v24 = vld [vmem:[%s742_s9 + $0x78] sm:$0xff]  ;;  %v386_v25 = vld [vmem:[%s883_s2] sm:$0xff] }
  0x14   : > { %300 = vmatpush.msra.mxu0 %v234_v4  ;;  %658 = vmatpush.msra.mxu2 %v234_v4 }
  0x15   : > { %452 = vmatpush.msra.mxu1 %v386_v25  ;;  %663 = vmatpush.msra.mxu3 %v386_v25 }
  0x16   : > { %301 = vmatpush.msra.mxu0 %v233_v5  ;;  %659 = vmatpush.msra.mxu2 %v233_v5 }
  0x18   : > { %302 = vmatpush.msra.mxu0 %v232_v6  ;;  %660 = vmatpush.msra.mxu2 %v232_v6 }
  0x1a   : > { %303 = vmatpush.msra.mxu0 %v231_v7  ;;  %661 = vmatpush.msra.mxu2 %v231_v7 }
  0x1b   : > { %620 = vmatmul.msk.f32.vlgmr.msra.gmra.mxu0 %vm239_vm0, %v215_v8  ;;  %628 = vmatmul.msk.f32.vlgmr.msra.gmra.mxu2 %vm239_vm0, %v223_v9 }
  0x23   : > { %621 = vmatmul.msk.f32.gmra.mxu0 %vm239_vm0, %v216_v10  ;;  %629 = vmatmul.msk.f32.gmra.mxu2 %vm239_vm0, %v224_v11 }
  0x2b   : > { %622 = vmatmul.msk.f32.gmra.mxu0 %vm239_vm0, %v217_v12  ;;  %630 = vmatmul.msk.f32.gmra.mxu2 %vm239_vm0, %v225_v13 }
  0x33   : > { %623 = vmatmul.msk.f32.gmra.mxu0 %vm239_vm0, %v218_v14  ;;  %631 = vmatmul.msk.f32.gmra.mxu2 %vm239_vm0, %v226_v15 }
  0x3b   : > { %624 = vmatmul.msk.f32.gmra.mxu0 %vm239_vm0, %v219_v17  ;;  %632 = vmatmul.msk.f32.gmra.mxu2 %vm239_vm0, %v227_v18 }
  0x43   : > { %625 = vmatmul.msk.f32.gmra.mxu0 %vm239_vm0, %v220_v19  ;;  %633 = vmatmul.msk.f32.gmra.mxu2 %vm239_vm0, %v228_v20 }
  0x4b   : > { %626 = vmatmul.msk.f32.gmra.mxu0 %vm239_vm0, %v221_v21  ;;  %634 = vmatmul.msk.f32.gmra.mxu2 %vm239_vm0, %v229_v22 }
  0x53   : > { %627 = vmatmul.msk.f32.gmra.mxu0 %vm239_vm0, %v222_v23  ;;  %635 = vmatmul.msk.f32.gmra.mxu2 %vm239_vm0, %v230_v24 }
  0x98   : > { %v305_v26 = vpop.f32.mrf.mxu0 }
  0x99   : > { %v353_v27 = vpack.c.bf16 %v305_v26, %v305_v26  ;;  %636 = vmatmul.msk.f32.vlgmr.msra.gmra.mxu1 %vm388_vm1, %v305_v26 }
  0x9b   : > { %370 = vst.msk [vmem:[%s789_s20] sm:$0xf] %vm369_vm2, %v353_v27 }
  0x9e   : > { %v329_v28 = vpop.f32.mrf.mxu2 }
  0x9f   : > { %v361_v29 = vpack.c.bf16 %v329_v28, %v329_v28 }
  0xa0   : > { %v308_v30 = vpop.f32.mrf.mxu0 }
  0xa1   : > { %378 = vst.msk [vmem:[%s789_s20 + $0x20] sm:$0xf] %vm369_vm2, %v361_v29  ;;  %v354_v31 = vpack.c.bf16 %v308_v30, %v308_v30  ;;  %637 = vmatmul.msk.f32.gmra.mxu1 %vm388_vm1, %v308_v30 }
  0xa3   : > { %371 = vst.msk [vmem:[%s789_s20 + $0x4] sm:$0xf] %vm369_vm2, %v354_v31 }
  0xa6   : > { %v332_v32 = vpop.f32.mrf.mxu2 }
  0xa7   : > { %v362_v33 = vpack.c.bf16 %v332_v32, %v332_v32  ;;  %645 = vmatmul.msk.f32.vlgmr.msra.gmra.mxu3 %vm388_vm1, %v332_v32 }
  0xa8   : > { %v311_v34 = vpop.f32.mrf.mxu0 }
  0xa9   : > { %379 = vst.msk [vmem:[%s789_s20 + $0x24] sm:$0xf] %vm369_vm2, %v362_v33  ;;  %v355_v35 = vpack.c.bf16 %v311_v34, %v311_v34  ;;  %638 = vmatmul.msk.f32.gmra.mxu1 %vm388_vm1, %v311_v34 }
  0xab   : > { %372 = vst.msk [vmem:[%s789_s20 + $0x8] sm:$0xf] %vm369_vm2, %v355_v35 }
  0xae   : > { %v335_v36 = vpop.f32.mrf.mxu2 }
  0xaf   : > { %v363_v37 = vpack.c.bf16 %v335_v36, %v335_v36  ;;  %646 = vmatmul.msk.f32.gmra.mxu3 %vm388_vm1, %v335_v36 }
  0xb0   : > { %v314_v38 = vpop.f32.mrf.mxu0 }
  0xb1   : > { %380 = vst.msk [vmem:[%s789_s20 + $0x28] sm:$0xf] %vm369_vm2, %v363_v37  ;;  %v356_v39 = vpack.c.bf16 %v314_v38, %v314_v38  ;;  %639 = vmatmul.msk.f32.gmra.mxu1 %vm388_vm1, %v314_v38 }
  0xb3   : > { %373 = vst.msk [vmem:[%s789_s20 + $0xc] sm:$0xf] %vm369_vm2, %v356_v39 }
  0xb6   : > { %v338_v40 = vpop.f32.mrf.mxu2 }
  0xb7   : > { %v364_v41 = vpack.c.bf16 %v338_v40, %v338_v40  ;;  %647 = vmatmul.msk.f32.gmra.mxu3 %vm388_vm1, %v338_v40 }
  0xb8   : > { %v317_v42 = vpop.f32.mrf.mxu0 }
  0xb9   : > { %381 = vst.msk [vmem:[%s789_s20 + $0x2c] sm:$0xf] %vm369_vm2, %v364_v41  ;;  %v357_v43 = vpack.c.bf16 %v317_v42, %v317_v42  ;;  %640 = vmatmul.msk.f32.gmra.mxu1 %vm388_vm1, %v317_v42 }
  0xbb   : > { %374 = vst.msk [vmem:[%s789_s20 + $0x10] sm:$0xf] %vm369_vm2, %v357_v43 }
  0xbe   : > { %v341_v44 = vpop.f32.mrf.mxu2 }
  0xbf   : > { %v365_v45 = vpack.c.bf16 %v341_v44, %v341_v44  ;;  %648 = vmatmul.msk.f32.gmra.mxu3 %vm388_vm1, %v341_v44 }
  0xc0   : > { %v320_v46 = vpop.f32.mrf.mxu0 }
  0xc1   : > { %382 = vst.msk [vmem:[%s789_s20 + $0x30] sm:$0xf] %vm369_vm2, %v365_v45  ;;  %v358_v47 = vpack.c.bf16 %v320_v46, %v320_v46  ;;  %641 = vmatmul.msk.f32.gmra.mxu1 %vm388_vm1, %v320_v46 }
  0xc3   : > { %375 = vst.msk [vmem:[%s789_s20 + $0x14] sm:$0xf] %vm369_vm2, %v358_v47 }
  0xc6   : > { %v344_v48 = vpop.f32.mrf.mxu2 }
  0xc7   : > { %v366_v49 = vpack.c.bf16 %v344_v48, %v344_v48  ;;  %649 = vmatmul.msk.f32.gmra.mxu3 %vm388_vm1, %v344_v48 }
  0xc8   : > { %v323_v50 = vpop.f32.mrf.mxu0 }
  0xc9   : > { %383 = vst.msk [vmem:[%s789_s20 + $0x34] sm:$0xf] %vm369_vm2, %v366_v49  ;;  %v359_v51 = vpack.c.bf16 %v323_v50, %v323_v50  ;;  %642 = vmatmul.msk.f32.gmra.mxu1 %vm388_vm1, %v323_v50 }
  0xcb   : > { %376 = vst.msk [vmem:[%s789_s20 + $0x18] sm:$0xf] %vm369_vm2, %v359_v51 }
  0xce   : > { %v347_v52 = vpop.f32.mrf.mxu2 }
  0xcf   : > { %v367_v53 = vpack.c.bf16 %v347_v52, %v347_v52  ;;  %650 = vmatmul.msk.f32.gmra.mxu3 %vm388_vm1, %v347_v52 }
  0xd0   : > { %v326_v54 = vpop.f32.mrf.mxu0 }
  0xd1   : > { %384 = vst.msk [vmem:[%s789_s20 + $0x38] sm:$0xf] %vm369_vm2, %v367_v53  ;;  %v360_v55 = vpack.c.bf16 %v326_v54, %v326_v54  ;;  %643 = vmatmul.msk.f32.gmra.mxu1 %vm388_vm1, %v326_v54 }
  0xd3   : > { %377 = vst.msk [vmem:[%s789_s20 + $0x1c] sm:$0xf] %vm369_vm2, %v360_v55 }
  0xd6   : > { %v350_v56 = vpop.f32.mrf.mxu2 }
  0xd7   : > { %v368_v57 = vpack.c.bf16 %v350_v56, %v350_v56  ;;  %651 = vmatmul.msk.f32.gmra.mxu3 %vm388_vm1, %v350_v56 }
  0xd9   : > { %385 = vst.msk [vmem:[%s789_s20 + $0x3c] sm:$0xf] %vm369_vm2, %v368_v57  ;;  %644 = vmatmul.msk.f32.gmra.mxu1 %vm388_vm1, %v329_v28 }
 0x116   : > { %v454_v58 = vpop.f32.mrf.mxu1 }
 0x117   : > { %503 = vst.msk [vmem:[%s844_s24] sm:$0xff] %vm502_vm3, %v454_v58 }
 0x11e   : > { %v457_v59 = vpop.f32.mrf.mxu1 }
 0x11f   : > { %504 = vst.msk [vmem:[%s844_s24 + $0x8] sm:$0xff] %vm502_vm3, %v457_v59 }
 0x126   : > { %v460_v60 = vpop.f32.mrf.mxu1 }
 0x127   : > { %505 = vst.msk [vmem:[%s844_s24 + $0x10] sm:$0xff] %vm502_vm3, %v460_v60 }
 0x12a   : > { %v481_v61 = vpop.f32.mrf.mxu3 }
 0x12b   : > { %512 = vst.msk [vmem:[%s844_s24 + $0x48] sm:$0xff] %vm502_vm3, %v481_v61 }
 0x12e   : > { %v463_v62 = vpop.f32.mrf.mxu1 }
 0x12f   : > { %506 = vst.msk [vmem:[%s844_s24 + $0x18] sm:$0xff] %vm502_vm3, %v463_v62 }
 0x132   : > { %v484_v63 = vpop.f32.mrf.mxu3 }
 0x133   : > { %513 = vst.msk [vmem:[%s844_s24 + $0x50] sm:$0xff] %vm502_vm3, %v484_v63 }
 0x136   : > { %v466_v0 = vpop.f32.mrf.mxu1 }
 0x137   : > { %507 = vst.msk [vmem:[%s844_s24 + $0x20] sm:$0xff] %vm502_vm3, %v466_v0 }
 0x13a   : > { %v487_v1 = vpop.f32.mrf.mxu3 }
 0x13b   : > { %514 = vst.msk [vmem:[%s844_s24 + $0x58] sm:$0xff] %vm502_vm3, %v487_v1 }
 0x13e   : > { %v469_v2 = vpop.f32.mrf.mxu1 }
 0x13f   : > { %508 = vst.msk [vmem:[%s844_s24 + $0x28] sm:$0xff] %vm502_vm3, %v469_v2 }
 0x142   : > { %v490_v3 = vpop.f32.mrf.mxu3 }
 0x143   : > { %515 = vst.msk [vmem:[%s844_s24 + $0x60] sm:$0xff] %vm502_vm3, %v490_v3 }
 0x146   : > { %v472_v4 = vpop.f32.mrf.mxu1 }
 0x147   : > { %509 = vst.msk [vmem:[%s844_s24 + $0x30] sm:$0xff] %vm502_vm3, %v472_v4 }
 0x14a   : > { %v493_v5 = vpop.f32.mrf.mxu3 }
 0x14b   : > { %516 = vst.msk [vmem:[%s844_s24 + $0x68] sm:$0xff] %vm502_vm3, %v493_v5 }
 0x14e   : > { %v475_v6 = vpop.f32.mrf.mxu1 }
 0x14f   : > { %510 = vst.msk [vmem:[%s844_s24 + $0x38] sm:$0xff] %vm502_vm3, %v475_v6 }
 0x152   : > { %v496_v7 = vpop.f32.mrf.mxu3 }
 0x153   : > { %517 = vst.msk [vmem:[%s844_s24 + $0x70] sm:$0xff] %vm502_vm3, %v496_v7 }
 0x156   : > { %v478_v8 = vpop.f32.mrf.mxu1 }
 0x157   : > { %511 = vst.msk [vmem:[%s844_s24 + $0x40] sm:$0xff] %vm502_vm3, %v478_v8 }
 0x15a   : > { %v499_v9 = vpop.f32.mrf.mxu3 }
 0x15b   : > { %518 = vst.msk [vmem:[%s844_s24 + $0x78] sm:$0xff] %vm502_vm3, %v499_v9 }
 0x15c PF: > { %s15_s15 = sadd.s32 1, %s678_s15  }
 0x15d   : > { %p12_p4 = scmp.ge.s32.totalorder %s15_s15, 4  }
 0x15f   :  { %14 = sbr.rel (!%p12_p4) target bundleno = 1 (0x1), region = 74 }

</bundles_post_ra>
